<compile_context>
chip_gen: v7x
topology: tpu7x:2x2x1
jax: 0.10.0
libtpu: 0.0.40
codegen_flags: <defaults>
</compile_context>

<pallas_src>
import functools

import jax
import jax.numpy as jnp
from jax import lax
from jax.experimental import pallas as pl
from jax.experimental.pallas import tpu as pltpu


def _round_up(x, m):
    return ((x + m - 1) // m) * m


def _gated_attn_kernel(x_ref, wab_ref, bab_ref, wct_ref, bc_ref, At_ref, *, dp):
    # x tile streamed in f32; cast to bf16 in-kernel for the MXU (VPU op,
    # hidden under the x DMA on this bandwidth-bound kernel).
    x = x_ref[...].astype(jnp.bfloat16)                          # (tn, L)

    # Fused gate projections: one MXU matmul, f32 accumulation.
    h = jnp.dot(x, wab_ref[...], preferred_element_type=jnp.float32)
    h = h + bab_ref[...]                                         # (tn, 2*Dp) f32

    # 128-aligned static lane split (Dp is a multiple of 128) -> free views.
    a = jnp.tanh(h[:, :dp])                                      # attention_a
    b = jax.nn.sigmoid(h[:, dp:])                                # attention_b
    gated = a * b                                                # (tn, Dp) f32

    # Class projection, emitted transposed so the output store is lane-dense:
    #   A^T[c, n] = sum_d wct[c, d] * gated[n, d]   (q . k^T style matmul)
    At = lax.dot_general(wct_ref[...], gated,
                         (((1,), (1,)), ((), ())),
                         preferred_element_type=jnp.float32)     # (C, tn)
    At_ref[...] = (At + bc_ref[...]).astype(At_ref.dtype)


def prepare_attn_params(wa, ba, wb, bb, wc, bc, *, weight_dtype=jnp.bfloat16):
    """One-time weight prep (hoisted out of the per-call path).

    wa, wb : (L, D) transposed nn.Linear weights;  ba, bb : (D,)
    wc     : (D, C) transposed;                    bc     : (C,)
    """
    L, D = wa.shape
    C = wc.shape[1]
    Dp = _round_up(D, 128)        # lane-align each gate half

    def pad_lanes(m):
        return jnp.pad(m, ((0, 0), (0, Dp - D))) if Dp != D else m

    wab = jnp.concatenate([pad_lanes(wa), pad_lanes(wb)], axis=1)       # (L, 2Dp)
    wab = wab.astype(weight_dtype)
    bab = jnp.concatenate([jnp.pad(ba, (0, Dp - D)),
                           jnp.pad(bb, (0, Dp - D))]).reshape(1, 2 * Dp)
    bab = bab.astype(jnp.float32)
    wct = jnp.pad(wc.T, ((0, 0), (0, Dp - D))).astype(jnp.float32)      # (C, Dp)
    bc_col = bc.reshape(C, 1).astype(jnp.float32)                       # (C, 1)
    return dict(wab=wab, bab=bab, wct=wct, bc=bc_col, L=L, D=D, Dp=Dp, C=C)


def attn_net_gated(x, params, *, tile_n=None, vmem_limit_bytes=None):
    """Pallas forward of Attn_Net_Gated. Returns (A, x) like the torch module."""
    N, L = x.shape
    assert L == params["L"], "feature dim mismatch"
    Dp, C = params["Dp"], params["C"]

    if x.dtype != jnp.float32:
        x = x.astype(jnp.float32)

    if tile_n is None:
        # Aim for >=4 grid steps when N allows (2 per v7x TensorCore plus DMA
        # pipelining), capped at 1024 rows to amortize the ~0.35us per-step
        # overhead on v5e/v6e while staying inside v7x's smaller VMEM.
        tile_n = min(1024, max(128, _round_up(pl.cdiv(N, 4), 128)))
    tile_n = max(128, _round_up(tile_n, 128))   # lane-dense output blocks

    grid = (pl.cdiv(N, tile_n),)
    kernel = functools.partial(_gated_attn_kernel, dp=Dp)

    A_t = pl.pallas_call(
        kernel,
        out_shape=jax.ShapeDtypeStruct((C, N), jnp.float32),
        grid_spec=pltpu.PrefetchScalarGridSpec(
            num_scalar_prefetch=0,
            grid=grid,
            in_specs=[
                pl.BlockSpec((tile_n, L), lambda i: (i, 0)),      # x tile (streamed)
                pl.BlockSpec((L, 2 * Dp), lambda i: (0, 0)),      # fused Wa|Wb
                pl.BlockSpec((1, 2 * Dp), lambda i: (0, 0)),      # fused ba|bb
                pl.BlockSpec((C, Dp), lambda i: (0, 0)),          # Wc^T (lane-padded)
                pl.BlockSpec((C, 1), lambda i: (0, 0)),           # bc column
            ],
            out_specs=pl.BlockSpec((C, tile_n), lambda i: (0, i)),  # A^T, lane-dense
        ),
        compiler_params=pltpu.CompilerParams(
            dimension_semantics=("parallel",),
            vmem_limit_bytes=vmem_limit_bytes),
    )(x, params["wab"], params["bab"], params["wct"], params["bc"])

    return A_t.T, x                                              # (N, C), x unchanged


def init_params(key, L, D, C):
    """Deterministic PyTorch-style (uniform fan_in) init, pre-transposed."""
    ks = jax.random.split(key, 6)
    lim_l = 1.0 / jnp.sqrt(L)
    lim_d = 1.0 / jnp.sqrt(D)
    wa = jax.random.uniform(ks[0], (L, D), jnp.float32, -lim_l, lim_l)
    ba = jax.random.uniform(ks[1], (D,), jnp.float32, -lim_l, lim_l)
    wb = jax.random.uniform(ks[2], (L, D), jnp.float32, -lim_l, lim_l)
    bb = jax.random.uniform(ks[3], (D,), jnp.float32, -lim_l, lim_l)
    wc = jax.random.uniform(ks[4], (D, C), jnp.float32, -lim_d, lim_d)
    bc = jax.random.uniform(ks[5], (C,), jnp.float32, -lim_d, lim_d)
    return wa, ba, wb, bb, wc, bc


def _reference(x, wa, ba, wb, bb, wc, bc):
    a = jnp.tanh(x @ wa + ba)
    b = jax.nn.sigmoid(x @ wb + bb)
    return (a * b) @ wc + bc


if __name__ == "__main__":
    key = jax.random.PRNGKey(0)

    # Test 1: n_classes == 1 (the CLAM-style attention head), ragged N that is
    # not a multiple of the tile to exercise the partial-last-block path, and
    # D=16 to exercise the Dp=128 lane-padding path.
    N1, L1, D1, C1 = 200, 32, 16, 1
    k1, k2, k3, k4 = jax.random.split(key, 4)
    x1 = jax.random.normal(k1, (N1, L1), jnp.float32)
    p1_raw = init_params(k2, L1, D1, C1)
    p1 = prepare_attn_params(*p1_raw)
    A1, x1_out = attn_net_gated(x1, p1, tile_n=128)
    A1 = jax.block_until_ready(A1)
    x1_out = jax.block_until_ready(x1_out)
    A1_ref = _reference(x1, *p1_raw)
    assert A1.shape == (N1, C1)
    assert x1_out.shape == (N1, L1)
    assert jnp.allclose(A1, A1_ref, atol=2e-2, rtol=2e-2), "C=1 mismatch"
    assert jnp.array_equal(x1_out, x1)

    # Test 2: small n_classes > 1 exercises the general (C, tile_n) projection.
    N2, L2, D2, C2 = 300, 64, 48, 3
    x2 = jax.random.normal(k3, (N2, L2), jnp.float32)
    p2_raw = init_params(k4, L2, D2, C2)
    p2 = prepare_attn_params(*p2_raw)
    A2, x2_out = attn_net_gated(x2, p2)          # default tile_n
    A2 = jax.block_until_ready(A2)
    x2_out = jax.block_until_ready(x2_out)
    A2_ref = _reference(x2, *p2_raw)
    assert A2.shape == (N2, C2)
    assert jnp.allclose(A2, A2_ref, atol=2e-2, rtol=2e-2), "C=3 mismatch"
    assert jnp.array_equal(x2_out, x2)

    print("KERNEL_OK")
</pallas_src>

<mosaic_0001>
module attributes {stable_mosaic.version = 11 : i64} {
  func.func @_gated_attn_kernel(%arg0: i32, %arg1: memref<128x32xf32, #tpu.memory_space<vmem>>, %arg2: memref<32x256xbf16, #tpu.memory_space<vmem>>, %arg3: memref<1x256xf32, #tpu.memory_space<vmem>>, %arg4: memref<1x128xf32, #tpu.memory_space<vmem>>, %arg5: memref<1x1xf32, #tpu.memory_space<vmem>>, %arg6: memref<1x128xf32, #tpu.memory_space<vmem>>) attributes {dimension_semantics = [#tpu.dimension_semantics<parallel>], iteration_bounds = array<i64: 2>, scalar_prefetch = 0 : i64, scratch_operands = 0 : i64, tpu.core_type = #tpu.core_type<tc>, window_params = [{transform_indices = @transform_0, window_bounds = array<i64: 128, 32>}, {pipeline_mode = #tpu.pipeline_mode<synchronous>, transform_indices = @transform_1, window_bounds = array<i64: 32, 256>}, {pipeline_mode = #tpu.pipeline_mode<synchronous>, transform_indices = @transform_2, window_bounds = array<i64: 1, 256>}, {pipeline_mode = #tpu.pipeline_mode<synchronous>, transform_indices = @transform_3, window_bounds = array<i64: 1, 128>}, {pipeline_mode = #tpu.pipeline_mode<synchronous>, transform_indices = @transform_4, window_bounds = array<i64: 1, 1>}, {transform_indices = @transform_5, window_bounds = array<i64: 1, 128>}]} {
    %c0 = arith.constant 0 : index
    %c0_0 = arith.constant 0 : index
    %0 = vector.load %arg1[%c0, %c0_0] : memref<128x32xf32, #tpu.memory_space<vmem>>, vector<128x32xf32>
    %1 = arith.truncf %0 : vector<128x32xf32> to vector<128x32xbf16>
    %c0_1 = arith.constant 0 : index
    %c0_2 = arith.constant 0 : index
    %2 = vector.load %arg2[%c0_1, %c0_2] : memref<32x256xbf16, #tpu.memory_space<vmem>>, vector<32x256xbf16>
    %cst = arith.constant dense<0.000000e+00> : vector<128x256xf32>
    %3 = tpu.matmul %1, %2, %cst {dimension_numbers = #tpu.dot_dimension_numbers<[1], [0], [0], [1], [0, 0, 1, 1], [], []>} : vector<128x32xbf16>, vector<32x256xbf16>, vector<128x256xf32> -> vector<128x256xf32>
    %c0_3 = arith.constant 0 : index
    %c0_4 = arith.constant 0 : index
    %4 = vector.load %arg3[%c0_3, %c0_4] : memref<1x256xf32, #tpu.memory_space<vmem>>, vector<1x256xf32>
    %5 = vector.broadcast %4 : vector<1x256xf32> to vector<128x256xf32>
    %6 = arith.addf %3, %5 : vector<128x256xf32>
    %7 = vector.extract_strided_slice %6 {offsets = [0, 0], sizes = [128, 128], strides = [1, 1]} : vector<128x256xf32> to vector<128x128xf32>
    %8 = math.tanh %7 : vector<128x128xf32>
    %9 = vector.extract_strided_slice %6 {offsets = [0, 128], sizes = [128, 128], strides = [1, 1]} : vector<128x256xf32> to vector<128x128xf32>
    %10 = arith.negf %9 : vector<128x128xf32>
    %11 = math.exp %10 : vector<128x128xf32>
    %cst_5 = arith.constant 1.000000e+00 : f32
    %12 = vector.broadcast %cst_5 : f32 to vector<128x128xf32>
    %13 = arith.addf %12, %11 : vector<128x128xf32>
    %14 = arith.divf %12, %13 : vector<128x128xf32>
    %15 = arith.mulf %8, %14 : vector<128x128xf32>
    %c0_6 = arith.constant 0 : index
    %c0_7 = arith.constant 0 : index
    %16 = vector.load %arg4[%c0_6, %c0_7] : memref<1x128xf32, #tpu.memory_space<vmem>>, vector<1x128xf32>
    %cst_8 = arith.constant dense<0.000000e+00> : vector<1x128xf32>
    %17 = tpu.matmul %16, %15, %cst_8 {dimension_numbers = #tpu.dot_dimension_numbers<[1], [1], [0], [0], [0, 0, 1, 0], [], []>} : vector<1x128xf32>, vector<128x128xf32>, vector<1x128xf32> -> vector<1x128xf32>
    %c0_9 = arith.constant 0 : index
    %c0_10 = arith.constant 0 : index
    %18 = vector.load %arg5[%c0_9, %c0_10] : memref<1x1xf32, #tpu.memory_space<vmem>>, vector<1x1xf32>
    %19 = vector.broadcast %18 : vector<1x1xf32> to vector<1x128xf32>
    %20 = arith.addf %17, %19 : vector<1x128xf32>
    %c0_11 = arith.constant 0 : index
    %c0_12 = arith.constant 0 : index
    %21 = vector.load %arg6[%c0_11, %c0_12] : memref<1x128xf32, #tpu.memory_space<vmem>>, vector<1x128xf32>
    tpu.vector_store %arg6[%c0_11, %c0_12], %20 {strides = array<i32>} : memref<1x128xf32, #tpu.memory_space<vmem>>, vector<1x128xf32>,
    return
  }
  func.func @transform_0(%arg0: i32) -> (i32, i32) {
    %c0_i32 = arith.constant 0 : i32
    %c0_i32_0 = arith.constant 0 : i32
    return %arg0, %c0_i32 : i32, i32
  }
  func.func @transform_1(%arg0: i32) -> (i32, i32) {
    %c0_i32 = arith.constant 0 : i32
    %c0_i32_0 = arith.constant 0 : i32
    %c0_i32_1 = arith.constant 0 : i32
    return %c0_i32, %c0_i32_0 : i32, i32
  }
  func.func @transform_2(%arg0: i32) -> (i32, i32) {
    %c0_i32 = arith.constant 0 : i32
    %c0_i32_0 = arith.constant 0 : i32
    %c0_i32_1 = arith.constant 0 : i32
    return %c0_i32, %c0_i32_0 : i32, i32
  }
  func.func @transform_3(%arg0: i32) -> (i32, i32) {
    %c0_i32 = arith.constant 0 : i32
    %c0_i32_0 = arith.constant 0 : i32
    %c0_i32_1 = arith.constant 0 : i32
    return %c0_i32, %c0_i32_0 : i32, i32
  }
  func.func @transform_4(%arg0: i32) -> (i32, i32) {
    %c0_i32 = arith.constant 0 : i32
    %c0_i32_0 = arith.constant 0 : i32
    %c0_i32_1 = arith.constant 0 : i32
    return %c0_i32, %c0_i32_0 : i32, i32
  }
  func.func @transform_5(%arg0: i32) -> (i32, i32) {
    %c0_i32 = arith.constant 0 : i32
    %c0_i32_0 = arith.constant 0 : i32
    return %c0_i32, %arg0 : i32, i32
  }
}

</mosaic_0001>

<bundles_post_ra>
// kernel: tpu_custom_call.1
= control target key start
LH: loop header
LB: loop body
LE: loop exit
PB: predicated region body
PF: predicated region fallthrough
CT: control target
= control target key end

     0   :  { %s1279_s0 = inlined_call_operand.vmem [shape: f32[200,32], index: 0, kind: input, shape index: {}]   ;;  %s1280_s1 = inlined_call_operand.vmem [shape: bf16[32,256], index: 1, kind: input, shape index: {}]   ;;  %s1281_s2 = inlined_call_operand.vmem [shape: f32[1,256], index: 2, kind: input, shape index: {}]   ;;  %s1282_s3 = inlined_call_operand.vmem [shape: f32[1,128], index: 3, kind: input, shape index: {}]   ;;  %s1283_s4 = inlined_call_operand.<no memory space> [shape: f32[1,1], index: 4, kind: input, shape index: {}]   ;;  %s1284_s5 = inlined_call_operand.hbm [shape: f32[1,200], index: 5, kind: output, shape index: {}]  }
   0x1   :  { %v10_v0 = vstv %s1283_s4 }
   0x2   :  { %11 = vst [vmem:[#allocation2] sm:$0x1] %v10_v0 }
   0x3   :  { %12 = vsyncpa [#allocation4], 0 }
   0x4   :  { %14 = vsyncpa [#allocation4 + $0x1], 0  ;;  %s1084_s20 = smov 0   ;;  %s1086_s21 = smov 0  }
   0x5   :  { %s1088_s22 = smov 0   ;;  %s1090_s23 = smov 0  }
   0x6 LB: > { %s722_s4 = sadd.s32 4294967295, %s1044_s23   ;;  %s723_s24 = sadd.s32 4294967294, %s1044_s23   ;;  %s1044_s23 = sphi %s1090_s23, %s1290_s23   ;;  %s1040_s22 = sphi %s1088_s22, %s1289_s22   ;;  %s1036_s21 = sphi %s1086_s21, %s1288_s21   ;;  %s1032_s20 = sphi %s1084_s20, %s1287_s20  }
   0x7   : > { %s1107_s25 = sadd.s32 1, %s1044_s23   ;;  %s137_s26 = sadd.s32 1, %s1040_s22 }
   0x8   : > { %s134_s27 = ssub.s32 %s1044_s23, %s1107_s25  ;;  %p147_p0 = scmp.ne.s32.totalorder %s1040_s22, %s1036_s21 }
   0x9   : > { %p135_p1 = scmp.eq.s32.totalorder %s134_s27, 0  ;;  %p148_p2 = scmp.eq.s32.totalorder %s722_s4, 1 }
   0xa   : > { %p153_p3 = scmp.ne.s32.totalorder %s1036_s21, %s1032_s20  ;;  %p154_p4 = scmp.eq.s32.totalorder %s723_s24, 1 }
   0xb   : > { %s1117_s28 = scalar_select %p135_p1, %s1040_s22, %s137_s26  }
   0xc   : > { %p1119_p5 = por %p148_p2, %p147_p0  ;;  %p1123_p6 = por %p154_p4, %p153_p3 }
   0xd   : > { %p726_p7 = scmp.ge.s32.totalorder %s1044_s23, 1  ;;  %p201_p8 = scmp.lt.s32.totalorder %s1044_s23, 3 }
   0xf   : > { %p202_p9 = pnand %p726_p7, %p201_p8 }
  0x10   : > { %v880_v1 = vld [vmem:[%s1280_s1 + $0x4] ss:$8 sps:$4 sm:$0xff] (!%p202_p9)   ;;  %s1132_s8 = sshll.u32 (!%p202_p9), %s722_s4, 4  ;;  %v882_v2 = vld [vmem:[%s1280_s1] ss:$8 sps:$4 sm:$0xff] (!%p202_p9)   ;;  %v1046_v3 = vmov (!%p202_p9), 0   ;;  %v277_v33 = vlaneseq (!%p202_p9) }
  0x11   : > { %205 = sbr.rel (%p202_p9) target bundleno = 569 (0x239), region = 40  ;;  %364 = vmatprep.mubr.bf16.mxu0 (!%p202_p9), %v1046_v3  ;;  %p237_p10 = scmp.lt.s32.totalorder (!%p202_p9), %s1132_s8, 24  ;;  %879 = vset.pattern.permute.xlu0 (!%p202_p9), %v1046_v3  ;;  %v883_v4 = vld [vmem:[%s1280_s1 + $0x14] ss:$8 sps:$4 sm:$0xff] (!%p202_p9)   ;;  %v885_v5 = vld [vmem:[%s1280_s1 + $0x10] ss:$8 sps:$4 sm:$0xff] (!%p202_p9)  }
  0x12   : > { %332 = vmatprep.subr.bf16.mxu0 (!%p202_p9), %v880_v1  ;;  %vm307_vm0 = vcmask (!%p202_p9), 261120   ;;  %v1047_v30 = vmov (!%p202_p9), 0.0|0.0   ;;  %vm1048_vm1 = vmmov (!%p202_p9), 0   ;;  %v1049_v31 = vmov (!%p202_p9), 0.0   ;;  %v574_v32 = vld [vmem:[#allocation2] sm:$0x1] (!%p202_p9)  ;;  %s1237_s12 = scalar_lea.hbm (!%p202_p9), %s1284_s5, %s1132_s8 }
  0x13   : > { %333 = vmatpush1.bf16.msra.mxu0 (!%p202_p9), %v882_v2  ;;  %812 = vmatprep.subr.bf16.mxu1 (!%p202_p9), %v1047_v30  ;;  %v1175_v34 = vshrl.u32 (!%p202_p9), %v277_v33, 7  ;;  %v275_v36 = vld [vmem:[%s1281_s2] sm:$0x3] (!%p202_p9)  ;;  %s230_s6 = sand.u32 (!%p202_p9), 1, %s1036_s21  }
  0x14   : > { %334 = vmatprep.subr.bf16.mxu0 (!%p202_p9), %v883_v4  ;;  %809 = vmatprep.mubr.msk.f32.mxu1 (!%p202_p9), %vm1048_vm1, %v1049_v31  ;;  %s231_s7 = scalar_lea.vmem (!%p202_p9), [#allocation3], %s230_s6  ;;  %s656_s13 = scalar_lea.sflag (!%p202_p9), [#allocation4], %s230_s6 }
  0x15   : > { %577 = vperm.xlu0 (!%p202_p9), %879, %v574_v32   ;;  %v283_v35 = vsub.s32 (!%p202_p9), 1, %v1175_v34  ;;  %v279_v45 = vsub.s32 (!%p202_p9), 0, %v1175_v34  ;;  %s668_s9 = sshll.u32 (!%p202_p9), %s231_s7, 4  ;;  %s1239_s9 = int_to_ptr.vmem [resolvable:$true] %s668_s9 }
  0x16   : > { %s982_s14 = scalar_lea.vmem (!%p202_p9), %s1239_s9, 16 }
  0x17   : > { %335 = vmatpush1.bf16.msra.mxu0 (!%p202_p9), %v885_v5  ;;  %v1181_v37 = vrot.slane (!%p202_p9), %v275_v36, %v283_v35  ;;  %v1188_v49 = vrot.slane (!%p202_p9), %v275_v36, %v279_v45  ;;  %p983_p11 = scmp.ne.s32.totalorder (!%p202_p9), %s1239_s9, %s982_s14 }
  0x18   : > { %s238_s15 = scalar_select %p237_p10, %s1132_s8, 24 }
  0x19   : > { %p984_p12 = pnand %p983_p11, %p1119_p5 }
  0x1a   : > { %s728_s16 = sshll.u32 %s238_s15, 3  ;;  %s1050_s15 = smov [#allocation3]  }
  0x1b   : > { %s1148_s19 = scalar_lea.vmem %s1279_s0, %s728_s16  ;;  %p985_p13 = pneg %p984_p12 }
  0x1c   : > { %v247_v6 = vld [vmem:[%s1148_s19] sm:$0xff]  ;;  %v248_v7 = vld [vmem:[%s1148_s19 + $0x8] sm:$0xff]  ;;  %v249_v9 = vld [vmem:[%s1148_s19 + $0x10] sm:$0xff]  ;;  %s986_s16 = sshll.u32 %s1050_s15, 4  ;;  %s987_s16 = int_to_ptr.vmem [resolvable:$false] %s986_s16 }
  0x1d   : > { %v263_v8 = vpack.c.bf16 %v248_v7, %v247_v6  ;;  %v250_v10 = vld [vmem:[%s1148_s19 + $0x18] sm:$0xff]  ;;  %v251_v12 = vld [vmem:[%s1148_s19 + $0x20] sm:$0xff]  ;;  %v252_v13 = vld [vmem:[%s1148_s19 + $0x28] sm:$0xff]  ;;  %s988_s17 = scalar_lea.vmem %s987_s16, 32  ;;  %p989_p0 = scmp.lt.s32.totalorder %s1239_s9, %s987_s16 }
  0x1e   : > { %v264_v11 = vpack.c.bf16 %v250_v10, %v249_v9  ;;  %v265_v14 = vpack.c.bf16 %v252_v13, %v251_v12  ;;  %v253_v15 = vld [vmem:[%s1148_s19 + $0x30] sm:$0xff]  ;;  %v254_v16 = vld [vmem:[%s1148_s19 + $0x38] sm:$0xff]  ;;  %v255_v18 = vld [vmem:[%s1148_s19 + $0x40] sm:$0xff]  ;;  %p990_p1 = scmp.lt.s32.totalorder %s988_s17, %s982_s14 }
  0x1f   : > { %733 = vmatmul.mubr.msk.bf16.vlgmr.msra.gmra.mrb[0].mxu0 %vm307_vm0, %v263_v8  ;;  %v266_v17 = vpack.c.bf16 %v254_v16, %v253_v15  ;;  %v256_v19 = vld [vmem:[%s1148_s19 + $0x48] sm:$0xff]  ;;  %v257_v21 = vld [vmem:[%s1148_s19 + $0x50] sm:$0xff]  ;;  %v258_v22 = vld [vmem:[%s1148_s19 + $0x58] sm:$0xff] }
  0x20   : > { %374 = vmatprep.mubr.bf16.mxu0 %v1046_v3  ;;  %v267_v20 = vpack.c.bf16 %v256_v19, %v255_v18  ;;  %v268_v23 = vpack.c.bf16 %v258_v22, %v257_v21  ;;  %v259_v24 = vld [vmem:[%s1148_s19 + $0x60] sm:$0xff]  ;;  %v260_v25 = vld [vmem:[%s1148_s19 + $0x68] sm:$0xff]  ;;  %v261_v27 = vld [vmem:[%s1148_s19 + $0x70] sm:$0xff]  ;;  %p991_p2 = por %p990_p1, %p989_p0 }
  0x21   : > { %v269_v26 = vpack.c.bf16 %v260_v25, %v259_v24  ;;  %v262_v28 = vld [vmem:[%s1148_s19 + $0x78] sm:$0xff] }
  0x22   : > { %v270_v29 = vpack.c.bf16 %v262_v28, %v261_v27  ;;  %p992_p3 = pnand %p991_p2, %p985_p13 }
  0x27   : > { %734 = vmatmul.mubr.msk.bf16.gmra.mrb[4].mxu0 %vm307_vm0, %v264_v11 }
  0x28   : > { %384 = vmatprep.mubr.bf16.mxu0 %v1046_v3 }
  0x2f   : > { %735 = vmatmul.mubr.msk.bf16.gmra.mrb[8].mxu0 %vm307_vm0, %v265_v14 }
  0x30   : > { %394 = vmatprep.mubr.bf16.mxu0 %v1046_v3 }
  0x37   : > { %736 = vmatmul.mubr.msk.bf16.gmra.mrb[12].mxu0 %vm307_vm0, %v266_v17 }
  0x38   : > { %404 = vmatprep.mubr.bf16.mxu0 %v1046_v3 }
  0x3f   : > { %737 = vmatmul.mubr.msk.bf16.gmra.mrb[16].mxu0 %vm307_vm0, %v267_v20 }
  0x40   : > { %414 = vmatprep.mubr.bf16.mxu0 %v1046_v3 }
  0x47   : > { %738 = vmatmul.mubr.msk.bf16.gmra.mrb[20].mxu0 %vm307_vm0, %v268_v23 }
  0x48   : > { %424 = vmatprep.mubr.bf16.mxu0 %v1046_v3 }
  0x4f   : > { %739 = vmatmul.mubr.msk.bf16.gmra.mrb[24].mxu0 %vm307_vm0, %v269_v26 }
  0x50   : > { %434 = vmatprep.mubr.bf16.mxu0 %v1046_v3 }
  0x57   : > { %740 = vmatmul.mubr.msk.bf16.gmra.mrb[28].mxu0 %vm307_vm0, %v270_v29 }
  0xf2   : > { %v366_v38 = vpop.f32.mrb[0].mxu0 }
  0xf3   : > { %v368_v39 = vpop.f32.mrb[1].mxu0  ;;  %v367_v55 = vadd.f32 %v366_v38, %v1188_v49 }
  0xf4   : > { %v369_v40 = vadd.f32 %v368_v39, %v1181_v37  ;;  %v370_v41 = vpop.f32.mrb[2].mxu0 }
  0xf5   : > { %v372_v42 = vpop.f32.mrb[3].mxu0  ;;  %v371_v58 = vadd.f32 %v370_v41, %v1188_v49 }
  0xf6   : > { %v741_v43 = vmul.f32 -1.442695, %v369_v40  ;;  %v373_v44 = vadd.f32 %v372_v42, %v1181_v37 }
  0xf8   : > { %886 = vpow2.f32 %v741_v43  ;;  %v742_v46 = vmul.f32 -1.442695, %v373_v44 }
  0xfa   : > { %888 = vpow2.f32 %v742_v46  ;;  %v376_v47 = vpop.f32.mrb[4].mxu0 }
  0xfb   : > { %v378_v48 = vpop.f32.mrb[5].mxu0  ;;  %v377_v5 = vadd.f32 %v376_v47, %v1188_v49 }
  0xfc   : > { %v379_v50 = vadd.f32 %v378_v48, %v1181_v37  ;;  %v380_v51 = vpop.f32.mrb[6].mxu0 }
  0xfd   : > { %v382_v52 = vpop.f32.mrb[7].mxu0  ;;  %v381_v8 = vadd.f32 %v380_v51, %v1188_v49 }
  0xfe   : > { %v743_v53 = vmul.f32 -1.442695, %v379_v50  ;;  %v383_v54 = vadd.f32 %v382_v52, %v1181_v37 }
 0x100   : > { %890 = vpow2.f32 %v743_v53  ;;  %v744_v56 = vmul.f32 -1.442695, %v383_v54 }
 0x102   : > { %v887_v57 = vpop.eup %886  ;;  %892 = vpow2.f32 %v744_v56  ;;  %v386_v59 = vpop.f32.mrb[8].mxu0 }
 0x103   : > { %v509_v60 = vadd.f32 1.0, %v887_v57  ;;  %v388_v61 = vpop.f32.mrb[9].mxu0  ;;  %894 = vtanh.f32 %v367_v55  ;;  %v387_v22 = vadd.f32 %v386_v59, %v1188_v49 }
 0x104   : > { %v889_v62 = vpop.eup %888  ;;  %v389_v63 = vadd.f32 %v388_v61, %v1181_v37  ;;  %v390_v0 = vpop.f32.mrb[10].mxu0 }
 0x105   : > { %896 = vrcp.f32 %v509_v60  ;;  %v510_v1 = vadd.f32 1.0, %v889_v62  ;;  %v392_v2 = vpop.f32.mrb[11].mxu0  ;;  %v391_v27 = vadd.f32 %v390_v0, %v1188_v49 }
 0x106   : > { %898 = vtanh.f32 %v371_v58  ;;  %v745_v3 = vmul.f32 -1.442695, %v389_v63  ;;  %v393_v4 = vadd.f32 %v392_v2, %v1181_v37 }
 0x107   : > { %900 = vrcp.f32 %v510_v1 }
 0x108   : > { %902 = vpow2.f32 %v745_v3  ;;  %v746_v6 = vmul.f32 -1.442695, %v393_v4 }
 0x10a   : > { %v891_v7 = vpop.eup %890  ;;  %904 = vpow2.f32 %v746_v6  ;;  %v396_v9 = vpop.f32.mrb[12].mxu0 }
 0x10b   : > { %v511_v10 = vadd.f32 1.0, %v891_v7  ;;  %v398_v11 = vpop.f32.mrb[13].mxu0  ;;  %906 = vtanh.f32 %v377_v5  ;;  %v397_v47 = vadd.f32 %v396_v9, %v1188_v49 }
 0x10c   : > { %v893_v12 = vpop.eup %892  ;;  %v399_v13 = vadd.f32 %v398_v11, %v1181_v37  ;;  %v400_v14 = vpop.f32.mrb[14].mxu0 }
 0x10d   : > { %908 = vrcp.f32 %v511_v10  ;;  %v512_v15 = vadd.f32 1.0, %v893_v12  ;;  %v402_v16 = vpop.f32.mrb[15].mxu0  ;;  %v895_v17 = vpop.eup %894  ;;  %v401_v53 = vadd.f32 %v400_v14, %v1188_v49 }
 0x10e   : > { %910 = vtanh.f32 %v381_v8  ;;  %v747_v18 = vmul.f32 -1.442695, %v399_v13  ;;  %v403_v19 = vadd.f32 %v402_v16, %v1181_v37 }
 0x10f   : > { %v897_v20 = vpop.eup %896  ;;  %912 = vrcp.f32 %v512_v15 }
 0x110   : > { %v899_v21 = vpop.eup %898  ;;  %914 = vpow2.f32 %v747_v18  ;;  %v748_v23 = vmul.f32 -1.442695, %v403_v19  ;;  %v557_v24 = vmul.f32 %v897_v20, %v895_v17 }
 0x111   : > { %v901_v25 = vpop.eup %900 }
 0x112   : > { %v903_v26 = vpop.eup %902  ;;  %916 = vpow2.f32 %v748_v23  ;;  %v406_v28 = vpop.f32.mrb[16].mxu0  ;;  %v558_v29 = vmul.f32 %v901_v25, %v899_v21 }
 0x113   : > { %v513_v31 = vadd.f32 1.0, %v903_v26  ;;  %v408_v32 = vpop.f32.mrb[17].mxu0  ;;  %918 = vtanh.f32 %v387_v22  ;;  %v407_v5 = vadd.f32 %v406_v28, %v1188_v49 }
 0x114   : > { %v905_v33 = vpop.eup %904  ;;  %v409_v35 = vadd.f32 %v408_v32, %v1181_v37  ;;  %v410_v36 = vpop.f32.mrb[18].mxu0  ;;  %v813_v38 = vpack.c.bf16 %v558_v29, %v557_v24 }
 0x115   : > { %920 = vrcp.f32 %v513_v31  ;;  %v514_v39 = vadd.f32 1.0, %v905_v33  ;;  %v412_v40 = vpop.f32.mrb[19].mxu0  ;;  %v907_v41 = vpop.eup %906  ;;  %v411_v10 = vadd.f32 %v410_v36, %v1188_v49 }
 0x116   : > { %922 = vtanh.f32 %v391_v27  ;;  %v749_v42 = vmul.f32 -1.442695, %v409_v35  ;;  %v413_v43 = vadd.f32 %v412_v40, %v1181_v37  ;;  %814 = vmatpush3.bf16.xpose.msra.mxu1 %v813_v38 }
 0x117   : > { %v909_v44 = vpop.eup %908  ;;  %924 = vrcp.f32 %v514_v39  ;;  %815 = vmatprep.subr.bf16.mxu1 %v1047_v30 }
 0x118   : > { %v911_v46 = vpop.eup %910  ;;  %926 = vpow2.f32 %v749_v42  ;;  %v750_v48 = vmul.f32 -1.442695, %v413_v43  ;;  %v559_v50 = vmul.f32 %v909_v44, %v907_v41 }
 0x119   : > { %v913_v51 = vpop.eup %912 }
 0x11a   : > { %v915_v52 = vpop.eup %914  ;;  %928 = vpow2.f32 %v750_v48  ;;  %v416_v54 = vpop.f32.mrb[20].mxu0  ;;  %v560_v55 = vmul.f32 %v913_v51, %v911_v46 }
 0x11b   : > { %v515_v56 = vadd.f32 1.0, %v915_v52  ;;  %v418_v57 = vpop.f32.mrb[21].mxu0  ;;  %930 = vtanh.f32 %v397_v47  ;;  %v417_v26 = vadd.f32 %v416_v54, %v1188_v49 }
 0x11c   : > { %v917_v58 = vpop.eup %916  ;;  %v419_v59 = vadd.f32 %v418_v57, %v1181_v37  ;;  %v420_v60 = vpop.f32.mrb[22].mxu0  ;;  %v816_v61 = vpack.c.bf16 %v560_v55, %v559_v50 }
 0x11d   : > { %932 = vrcp.f32 %v515_v56  ;;  %v516_v62 = vadd.f32 1.0, %v917_v58  ;;  %v422_v63 = vpop.f32.mrb[23].mxu0  ;;  %v919_v0 = vpop.eup %918  ;;  %v421_v32 = vadd.f32 %v420_v60, %v1188_v49 }
 0x11e   : > { %934 = vtanh.f32 %v401_v53  ;;  %v751_v1 = vmul.f32 -1.442695, %v419_v59  ;;  %v423_v2 = vadd.f32 %v422_v63, %v1181_v37  ;;  %817 = vmatpush3.bf16.xpose.msra.mxu1 %v816_v61 }
 0x11f   : > { %v921_v3 = vpop.eup %920  ;;  %936 = vrcp.f32 %v516_v62  ;;  %818 = vmatprep.subr.bf16.mxu1 %v1047_v30 }
 0x120   : > { %v923_v4 = vpop.eup %922  ;;  %938 = vpow2.f32 %v751_v1  ;;  %v752_v6 = vmul.f32 -1.442695, %v423_v2  ;;  %v561_v7 = vmul.f32 %v921_v3, %v919_v0 }
 0x121   : > { %v925_v8 = vpop.eup %924 }
 0x122   : > { %v927_v9 = vpop.eup %926  ;;  %940 = vpow2.f32 %v752_v6  ;;  %v426_v11 = vpop.f32.mrb[24].mxu0  ;;  %v562_v12 = vmul.f32 %v925_v8, %v923_v4 }
 0x123   : > { %v517_v13 = vadd.f32 1.0, %v927_v9  ;;  %v428_v14 = vpop.f32.mrb[25].mxu0  ;;  %942 = vtanh.f32 %v407_v5  ;;  %v427_v52 = vadd.f32 %v426_v11, %v1188_v49 }
 0x124   : > { %v929_v15 = vpop.eup %928  ;;  %v429_v16 = vadd.f32 %v428_v14, %v1181_v37  ;;  %v430_v17 = vpop.f32.mrb[26].mxu0  ;;  %v819_v18 = vpack.c.bf16 %v562_v12, %v561_v7 }
 0x125   : > { %944 = vrcp.f32 %v517_v13  ;;  %v518_v19 = vadd.f32 1.0, %v929_v15  ;;  %v432_v20 = vpop.f32.mrb[27].mxu0  ;;  %v931_v21 = vpop.eup %930  ;;  %v431_v57 = vadd.f32 %v430_v17, %v1188_v49 }
 0x126   : > { %946 = vtanh.f32 %v411_v10  ;;  %v753_v22 = vmul.f32 -1.442695, %v429_v16  ;;  %v433_v23 = vadd.f32 %v432_v20, %v1181_v37  ;;  %820 = vmatpush3.bf16.xpose.msra.mxu1 %v819_v18 }
 0x127   : > { %v933_v24 = vpop.eup %932  ;;  %948 = vrcp.f32 %v518_v19  ;;  %821 = vmatprep.subr.bf16.mxu1 %v1047_v30 }
 0x128   : > { %v935_v25 = vpop.eup %934  ;;  %950 = vpow2.f32 %v753_v22  ;;  %v754_v27 = vmul.f32 -1.442695, %v433_v23  ;;  %v563_v28 = vmul.f32 %v933_v24, %v931_v21  ;;  %v573_v24 = vld [vmem:[%s1282_s3] sm:$0x1] }
 0x129   : > { %v937_v29 = vpop.eup %936 }
 0x12a   : > { %v939_v31 = vpop.eup %938  ;;  %952 = vpow2.f32 %v754_v27  ;;  %v436_v33 = vpop.f32.mrb[28].mxu0  ;;  %v564_v35 = vmul.f32 %v937_v29, %v935_v25 }
 0x12b   : > { %v519_v36 = vadd.f32 1.0, %v939_v31  ;;  %v438_v38 = vpop.f32.mrb[29].mxu0  ;;  %954 = vtanh.f32 %v417_v26  ;;  %v437_v1 = vadd.f32 %v436_v33, %v1188_v49  ;;  %v578_v25 = vpop.permute.xlu0 %577 }
 0x12c   : > { %v941_v39 = vpop.eup %940  ;;  %v439_v40 = vadd.f32 %v438_v38, %v1181_v37  ;;  %v440_v41 = vpop.f32.mrb[30].mxu0  ;;  %v822_v42 = vpack.c.bf16 %v564_v35, %v563_v28  ;;  %v583_v26 = vrot.slane %v578_v25, %v279_v45 }
 0x12d   : > { %956 = vrcp.f32 %v519_v36  ;;  %v520_v43 = vadd.f32 1.0, %v941_v39  ;;  %v442_v44 = vpop.f32.mrb[31].mxu0  ;;  %v943_v46 = vpop.eup %942  ;;  %v441_v5 = vadd.f32 %v440_v41, %v1188_v49 }
 0x12e   : > { %958 = vtanh.f32 %v421_v32  ;;  %v755_v47 = vmul.f32 -1.442695, %v439_v40  ;;  %v443_v48 = vadd.f32 %v442_v44, %v1181_v37  ;;  %823 = vmatpush3.bf16.xpose.msra.mxu1 %v822_v42 }
 0x12f   : > { %v945_v50 = vpop.eup %944  ;;  %960 = vrcp.f32 %v520_v43  ;;  %824 = vmatprep.subr.bf16.mxu1 %v1047_v30 }
 0x130   : > { %v947_v51 = vpop.eup %946  ;;  %962 = vpow2.f32 %v755_v47  ;;  %v756_v53 = vmul.f32 -1.442695, %v443_v48  ;;  %v565_v54 = vmul.f32 %v945_v50, %v943_v46 }
 0x131   : > { %v949_v55 = vpop.eup %948 }
 0x132   : > { %v951_v56 = vpop.eup %950  ;;  %964 = vpow2.f32 %v756_v53  ;;  %v566_v58 = vmul.f32 %v949_v55, %v947_v51 }
 0x133   : > { %v521_v59 = vadd.f32 1.0, %v951_v56  ;;  %966 = vtanh.f32 %v427_v52 }
 0x134   : > { %v953_v60 = vpop.eup %952  ;;  %v825_v37 = vpack.c.bf16 %v566_v58, %v565_v54 }
 0x135   : > { %968 = vrcp.f32 %v521_v59  ;;  %v522_v61 = vadd.f32 1.0, %v953_v60  ;;  %v955_v62 = vpop.eup %954 }
 0x136   : > { %970 = vtanh.f32 %v431_v57  ;;  %826 = vmatpush3.bf16.xpose.msra.mxu1 %v825_v37 }
 0x137   : > { %v957_v63 = vpop.eup %956  ;;  %972 = vrcp.f32 %v522_v61  ;;  %827 = vmatprep.subr.bf16.mxu1 %v1047_v30 }
 0x138   : > { %v959_v0 = vpop.eup %958  ;;  %v567_v2 = vmul.f32 %v957_v63, %v955_v62  ;;  %974 = vtanh.f32 %v437_v1 }
 0x139   : > { %v961_v3 = vpop.eup %960 }
 0x13a   : > { %v963_v4 = vpop.eup %962  ;;  %v568_v6 = vmul.f32 %v961_v3, %v959_v0 }
 0x13b   : > { %v523_v7 = vadd.f32 1.0, %v963_v4 }
 0x13c   : > { %v965_v8 = vpop.eup %964  ;;  %v828_v9 = vpack.c.bf16 %v568_v6, %v567_v2 }
 0x13d   : > { %976 = vrcp.f32 %v523_v7  ;;  %v524_v10 = vadd.f32 1.0, %v965_v8  ;;  %v967_v11 = vpop.eup %966 }
 0x13e   : > { %978 = vtanh.f32 %v441_v5  ;;  %829 = vmatpush3.bf16.xpose.msra.mxu1 %v828_v9 }
 0x13f   : > { %v969_v12 = vpop.eup %968  ;;  %980 = vrcp.f32 %v524_v10  ;;  %830 = vmatprep.subr.bf16.mxu1 %v1047_v30 }
 0x140   : > { %v971_v13 = vpop.eup %970  ;;  %v569_v14 = vmul.f32 %v969_v12, %v967_v11 }
 0x141   : > { %v973_v15 = vpop.eup %972 }
 0x142   : > { %v570_v16 = vmul.f32 %v973_v15, %v971_v13  ;;  %v975_v17 = vpop.eup %974 }
 0x144   : > { %v831_v49 = vpack.c.bf16 %v570_v16, %v569_v14 }
 0x146   : > { %832 = vmatpush3.bf16.xpose.msra.mxu1 %v831_v49 }
 0x147   : > { %v977_v18 = vpop.eup %976  ;;  %833 = vmatprep.subr.bf16.mxu1 %v1047_v30 }
 0x148   : > { %v979_v19 = vpop.eup %978  ;;  %v571_v20 = vmul.f32 %v977_v18, %v975_v17 }
 0x149   : > { %v981_v21 = vpop.eup %980 }
 0x14a   : > { %v572_v22 = vmul.f32 %v981_v21, %v979_v19 }
 0x14c   : > { %v834_v23 = vpack.c.bf16 %v572_v22, %v571_v20 }
 0x14e   : > { %835 = vmatpush3.bf16.xpose.msra.mxu1 %v834_v23 }
 0x155   : > { %810 = vmatmul.mubr.f32.vlgmr.msra.gmra.mrb[0].mxu1 %v573_v24 }
 0x228   : > { %v650_v30 = vpop.f32.mrb[0].mxu1 }
 0x229   : > { %v651_v27 = vadd.f32 %v650_v30, %v583_v26  ;;  %v811_v28 = vpop.f32.mrb[1].mxu1 }
 0x22b   : > { %654 = vst [vmem:[%s231_s7] sm:$0x1] %v651_v27 }
 0x22c   : > { %995 = shalt.err (!%p992_p3)
}
 0x22d   : > { %s996_s8 = scalar_lea.hbm %s1237_s12, 16  ;;  %s1000_s4 = scalar_lea.hbm %s1284_s5, 32 }
 0x22e   : > { %p997_p4 = scmp.ne.s32.totalorder %s1237_s12, %s996_s8  ;;  %p1001_p9 = scmp.lt.u32.totalorder %s1237_s12, %s1284_s5 }
 0x22f   : > { %p1002_p10 = scmp.lt.u32.totalorder %s1000_s4, %s996_s8  ;;  %p1004_p12 = scmp.lt.u32.totalorder %s996_s8, %s1237_s12 }
 0x230   : > { %p998_p7 = pnand %p997_p4, %p1119_p5 }
 0x231   : > { %p1003_p11 = por %p1002_p10, %p1001_p9 }
 0x232   : > { %p999_p8 = pneg %p998_p7 }
 0x233   : > { %p1005_p13 = por %p1004_p12, %p1003_p11 }
 0x235   : > { %p1006_p0 = pnand %p1005_p13, %p999_p8 }
 0x237   : > { %1009 = shalt.err (!%p1006_p0)
}
 0x238   : > { %836 = dma.vmem_to_hbm [thread:$0]  (%p1119_p5), %s1239_s9, 16, %s1237_s12, %s656_s13  }
 0x239 PF: > { %p842_p1 = scmp.ge.s32.totalorder %s1044_s23, 2  ;;  %s680_s27 = sand.u32 1, %s1032_s20  }
 0x23a   : > { %s681_s6 = scalar_lea.sflag [#allocation4], %s680_s27 }
 0x23b   : > { %p839_p2 = pnand %p842_p1, %p1123_p6 }
 0x23d   : > { %1027 = dma.done.wait (!%p839_p2), %s681_s6, 16  }
 0x23e   : > { %1029 = vsyncadd (!%p839_p2), %s681_s6, 4294967280  ;;  %p17_p3 = scmp.ge.s32.totalorder %s1107_s25, 4   ;;  %s1287_s20 = smov %s1036_s21 }
 0x23f   : > { %s1288_s21 = smov %s1040_s22  ;;  %s1289_s22 = smov %s1117_s28 }
 0x240   : > { %s1290_s23 = smov %s1107_s25  ;;  %19 = sbr.rel (!%p17_p3) target bundleno = 6 (0x6), region = 75 }
 0x247   :  { %685 = vsyncpa [#allocation4], 1 }
 0x248   :  { %687 = vsyncpa [#allocation4 + $0x1], 1 }

</bundles_post_ra>
